<compile_context>
chip_gen: v6e
topology: v6e:2x2x1
jax: 0.10.0
libtpu: 0.0.40
codegen_flags: <defaults>
</compile_context>

<pallas_src>
import functools

import jax
import jax.numpy as jnp
from jax.experimental import pallas as pl
from jax.experimental.pallas import tpu as pltpu


def _round_up(n, m):
    return ((n + m - 1) // m) * m


# --------------------------------------------------------------------------
# Fused MLP kernel: x @ W0 + b0 -> act -> ... -> @ W_last + b_last
# --------------------------------------------------------------------------
def _fused_mlp_kernel(*refs, activation, n_layers):
    """refs = (x_ref, w0, b0, w1, b1, ..., w_{L-1}, b_{L-1}, o_ref).

    x_ref: [tb, IN_pad] (compute dtype); w_i: [fi_pad, fo_pad] (compute dtype);
    b_i: [1, fo_pad] f32; o_ref: [tb, OUT_pad] f32.
    Padded weight/bias entries are zero and act(0) == 0 for relu / leaky_relu /
    tanh, so padding is exact.  Rows are fully independent, so garbage rows in
    a ragged edge batch block stay confined to masked output rows.
    """
    x_ref = refs[0]
    o_ref = refs[-1]
    wb = refs[1:-1]

    h = x_ref[...]
    for i in range(n_layers):
        w_ref = wb[2 * i]
        b_ref = wb[2 * i + 1]
        # Matmul inputs in the (possibly bf16) compute dtype; accumulate in f32.
        h = jnp.dot(h.astype(w_ref.dtype), w_ref[...],
                    preferred_element_type=jnp.float32)
        h = h + b_ref[...]  # f32 bias, broadcast [1, fo_pad] over batch rows
        if i < n_layers - 1:
            if activation == "relu":
                h = jnp.maximum(h, 0.0)
            elif activation == "leaky_relu":
                h = jnp.where(h >= 0.0, h, 0.1 * h)  # slope 0.1 == nn.LeakyReLU(0.1)
            else:  # tanh (PyTorch fallback for any other string)
                h = jnp.tanh(h)
    o_ref[...] = h.astype(o_ref.dtype)


# --------------------------------------------------------------------------
# Parameter init + one-time TPU layout prep (padding/casting done once)
# --------------------------------------------------------------------------
def init_mlp_params(key, input_size, hidden_sizes, num_classes):
    """Deterministic parameter init (shapes match the nn.Linear layers).

    Weights stored as [in, out] (== PyTorch weight.T) for x @ W matmuls.
    """
    layer_sizes = [input_size] + list(hidden_sizes) + [num_classes]
    params = []
    for i in range(len(layer_sizes) - 1):
        fan_in, fan_out = layer_sizes[i], layer_sizes[i + 1]
        key, wk, bk = jax.random.split(key, 3)
        bound = 1.0 / jnp.sqrt(fan_in)
        w = jax.random.uniform(wk, (fan_in, fan_out), jnp.float32, -bound, bound)
        b = jax.random.uniform(bk, (fan_out,), jnp.float32, -bound, bound)
        params.append((w, b))
    return params


def prepare_padded_params(params, compute_dtype=jnp.bfloat16):
    """Zero-pad every layer so all matmul dims are lane/sublane friendly.

    - First layer's IN padded to a multiple of 128 (x lane dim).
    - Every OUT padded to a multiple of 128 (lane-dense stores + next matmul).
    - Weights stored in `compute_dtype` (bf16 by default: half the HBM bytes,
      native MXU input); biases kept f32 so the post-accumulate add stays f32.
    """
    padded = []
    prev_out_pad = None
    for idx, (w, b) in enumerate(params):
        fi, fo = w.shape
        fi_pad = _round_up(fi, 128) if idx == 0 else prev_out_pad
        fo_pad = _round_up(fo, 128)
        w_p = (jnp.zeros((fi_pad, fo_pad), compute_dtype)
               .at[:fi, :fo].set(w.astype(compute_dtype)))
        b_p = jnp.zeros((1, fo_pad), jnp.float32).at[0, :fo].set(b)
        padded.append((w_p, b_p))
        prev_out_pad = fo_pad
    return padded


# --------------------------------------------------------------------------
# Forward pass
# --------------------------------------------------------------------------
def mlp_image_classifier_forward(x_nchw, padded_params, num_classes,
                                 activation_function="relu", batch_tile=1024):
    """Forward pass of MLPImageClassifier as a single fused Pallas kernel.

    x_nchw: [B, C, H, W] float32. Returns logits [B, num_classes] float32.
    """
    act = activation_function.lower()
    if act not in ("relu", "leaky_relu"):
        act = "tanh"  # same fallback as the PyTorch module

    compute_dtype = padded_params[0][0].dtype
    n_layers = len(padded_params)
    IN_pad = padded_params[0][0].shape[0]
    OUT_pad = padded_params[-1][0].shape[1]

    B = x_nchw.shape[0]
    x = x_nchw.reshape(B, -1)  # == torch x.view(x.size(0), -1)
    IN = x.shape[1]
    # Cast once at the boundary (producers should emit bf16 directly in a real
    # pipeline to also avoid this pass).  No batch padding; feature padding only
    # if input_size is not already a multiple of 128 (it is 1024 here).
    x = x.astype(compute_dtype)
    if IN_pad != IN:
        x = jnp.pad(x, ((0, 0), (0, IN_pad - IN)))

    # Batch tiling: block sublane dim must be a multiple of 8 or equal to B.
    # Keep >= 2 grid steps whenever B > 8 so v7x's 2nd TensorCore gets work,
    # and balance tiles so awkward batch sizes don't waste DMA/MXU work.
    if B <= 8:
        tb = B                      # single block == full batch dim (legal)
    else:
        tb = min(batch_tile, _round_up(pl.cdiv(B, 2), 8))
        tb = max(tb, 8)
    grid_b = pl.cdiv(B, tb)         # ragged last block handled by masked writes

    # BlockSpecs: x / out tiled over batch; weights & biases resident in VMEM
    # (index_map always (0, 0) so they are not re-DMA'd per batch tile).
    in_specs = [pl.BlockSpec((tb, IN_pad), lambda i: (i, 0))]
    flat_wb = []
    for (w_p, b_p) in padded_params:
        fi_pad, fo_pad = w_p.shape
        in_specs.append(pl.BlockSpec((fi_pad, fo_pad), lambda i: (0, 0)))
        in_specs.append(pl.BlockSpec((1, fo_pad), lambda i: (0, 0)))
        flat_wb.extend([w_p, b_p])

    # Explicit scoped-VMEM budget: double-buffered x/out tiles + (conservatively
    # double-buffered) resident weights + slack.  v5e's default is only 16 MiB.
    wb_bytes = sum(int(w.size) * w.dtype.itemsize + int(b.size) * b.dtype.itemsize
                   for (w, b) in padded_params)
    x_tile_bytes = tb * IN_pad * jnp.dtype(compute_dtype).itemsize
    out_tile_bytes = tb * OUT_pad * 4
    vmem_bytes = 2 * (x_tile_bytes + out_tile_bytes + wb_bytes) + (4 << 20)
    vmem_limit = int(min(max(vmem_bytes, 16 << 20), 64 << 20))

    kernel = functools.partial(_fused_mlp_kernel, activation=act,
                               n_layers=n_layers)

    logits_pad = pl.pallas_call(
        kernel,
        out_shape=jax.ShapeDtypeStruct((B, OUT_pad), jnp.float32),
        grid=(grid_b,),
        in_specs=in_specs,
        out_specs=pl.BlockSpec((tb, OUT_pad), lambda i: (i, 0)),
        compiler_params=pltpu.CompilerParams(
            dimension_semantics=("parallel",),
            vmem_limit_bytes=vmem_limit,
        ),
    )(x, *flat_wb)

    # Lane-dense 128-wide stores kept inside the kernel; tiny slice here.
    return logits_pad[:, :num_classes]


# --------------------------------------------------------------------------
# Demo / correctness check
# --------------------------------------------------------------------------
def _reference_forward(x_nchw, params, act):
    h = x_nchw.reshape(x_nchw.shape[0], -1)
    for i, (w, b) in enumerate(params):
        h = h @ w + b
        if i < len(params) - 1:
            if act == "relu":
                h = jnp.maximum(h, 0.0)
            elif act == "leaky_relu":
                h = jnp.where(h >= 0.0, h, 0.1 * h)
            else:
                h = jnp.tanh(h)
    return h


if __name__ == "__main__":
    # Small, deterministic example consistent with the module:
    # images [B=2, C=4, H=16, W=16] -> input_size = 4*16*16 = 1024
    key = jax.random.PRNGKey(0)
    key, xk, pk = jax.random.split(key, 3)

    B, C, H, W = 2, 4, 16, 16
    input_size = C * H * W
    hidden_sizes = [32, 32]
    num_classes = 10

    x = jax.random.normal(xk, (B, C, H, W), jnp.float32)
    params = init_mlp_params(pk, input_size, hidden_sizes, num_classes)

    # f32 path: exact against the pure-JAX reference (1e-5).
    pp_f32 = prepare_padded_params(params, compute_dtype=jnp.float32)
    logits = mlp_image_classifier_forward(x, pp_f32, num_classes,
                                          activation_function="relu")
    logits = jax.block_until_ready(logits)
    assert logits.shape == (B, num_classes)
    ref = _reference_forward(x, params, "relu")
    assert jnp.allclose(logits, ref, atol=1e-5, rtol=1e-5)

    # bf16 HBM path (f32 accumulate): all three activation branches, relaxed tol.
    pp_bf16 = prepare_padded_params(params, compute_dtype=jnp.bfloat16)
    for act in ("relu", "leaky_relu", "tanh"):
        out = mlp_image_classifier_forward(x, pp_bf16, num_classes,
                                           activation_function=act)
        out = jax.block_until_ready(out)
        ref = _reference_forward(x, params, act)
        assert out.shape == (B, num_classes)
        assert jnp.allclose(out, ref, atol=3e-2, rtol=3e-2), act

    print("KERNEL_OK")
</pallas_src>

<mosaic_0001>
module attributes {stable_mosaic.version = 11 : i64} {
  func.func @_fused_mlp_kernel(%arg0: i32, %arg1: memref<2x1024xf32, #tpu.memory_space<vmem>>, %arg2: memref<1024x128xf32, #tpu.memory_space<vmem>>, %arg3: memref<1x128xf32, #tpu.memory_space<vmem>>, %arg4: memref<128x128xf32, #tpu.memory_space<vmem>>, %arg5: memref<1x128xf32, #tpu.memory_space<vmem>>, %arg6: memref<128x128xf32, #tpu.memory_space<vmem>>, %arg7: memref<1x128xf32, #tpu.memory_space<vmem>>, %arg8: memref<2x128xf32, #tpu.memory_space<vmem>>) attributes {dimension_semantics = [#tpu.dimension_semantics<parallel>], iteration_bounds = array<i64: 1>, scalar_prefetch = 0 : i64, scratch_operands = 0 : i64, tpu.core_type = #tpu.core_type<tc>, window_params = [{transform_indices = @transform_0, window_bounds = array<i64: 2, 1024>}, {pipeline_mode = #tpu.pipeline_mode<synchronous>, transform_indices = @transform_1, window_bounds = array<i64: 1024, 128>}, {pipeline_mode = #tpu.pipeline_mode<synchronous>, transform_indices = @transform_2, window_bounds = array<i64: 1, 128>}, {pipeline_mode = #tpu.pipeline_mode<synchronous>, transform_indices = @transform_3, window_bounds = array<i64: 128, 128>}, {pipeline_mode = #tpu.pipeline_mode<synchronous>, transform_indices = @transform_4, window_bounds = array<i64: 1, 128>}, {pipeline_mode = #tpu.pipeline_mode<synchronous>, transform_indices = @transform_5, window_bounds = array<i64: 128, 128>}, {pipeline_mode = #tpu.pipeline_mode<synchronous>, transform_indices = @transform_6, window_bounds = array<i64: 1, 128>}, {transform_indices = @transform_7, window_bounds = array<i64: 2, 128>}]} {
    %c0 = arith.constant 0 : index
    %c0_0 = arith.constant 0 : index
    %0 = vector.load %arg1[%c0, %c0_0] : memref<2x1024xf32, #tpu.memory_space<vmem>>, vector<2x1024xf32>
    %c0_1 = arith.constant 0 : index
    %c0_2 = arith.constant 0 : index
    %1 = vector.load %arg2[%c0_1, %c0_2] : memref<1024x128xf32, #tpu.memory_space<vmem>>, vector<1024x128xf32>
    %cst = arith.constant dense<0.000000e+00> : vector<2x128xf32>
    %2 = tpu.matmul %0, %1, %cst {dimension_numbers = #tpu.dot_dimension_numbers<[1], [0], [0], [1], [0, 0, 1, 1], [], []>} : vector<2x1024xf32>, vector<1024x128xf32>, vector<2x128xf32> -> vector<2x128xf32>
    %c0_3 = arith.constant 0 : index
    %c0_4 = arith.constant 0 : index
    %3 = vector.load %arg3[%c0_3, %c0_4] : memref<1x128xf32, #tpu.memory_space<vmem>>, vector<1x128xf32>
    %4 = vector.broadcast %3 : vector<1x128xf32> to vector<2x128xf32>
    %5 = arith.addf %2, %4 : vector<2x128xf32>
    %cst_5 = arith.constant 0.000000e+00 : f32
    %6 = vector.broadcast %cst_5 : f32 to vector<2x128xf32>
    %7 = arith.maximumf %5, %6 : vector<2x128xf32>
    %c0_6 = arith.constant 0 : index
    %c0_7 = arith.constant 0 : index
    %8 = vector.load %arg4[%c0_6, %c0_7] : memref<128x128xf32, #tpu.memory_space<vmem>>, vector<128x128xf32>
    %cst_8 = arith.constant dense<0.000000e+00> : vector<2x128xf32>
    %9 = tpu.matmul %7, %8, %cst_8 {dimension_numbers = #tpu.dot_dimension_numbers<[1], [0], [0], [1], [0, 0, 1, 1], [], []>} : vector<2x128xf32>, vector<128x128xf32>, vector<2x128xf32> -> vector<2x128xf32>
    %c0_9 = arith.constant 0 : index
    %c0_10 = arith.constant 0 : index
    %10 = vector.load %arg5[%c0_9, %c0_10] : memref<1x128xf32, #tpu.memory_space<vmem>>, vector<1x128xf32>
    %11 = vector.broadcast %10 : vector<1x128xf32> to vector<2x128xf32>
    %12 = arith.addf %9, %11 : vector<2x128xf32>
    %cst_11 = arith.constant 0.000000e+00 : f32
    %13 = vector.broadcast %cst_11 : f32 to vector<2x128xf32>
    %14 = arith.maximumf %12, %13 : vector<2x128xf32>
    %c0_12 = arith.constant 0 : index
    %c0_13 = arith.constant 0 : index
    %15 = vector.load %arg6[%c0_12, %c0_13] : memref<128x128xf32, #tpu.memory_space<vmem>>, vector<128x128xf32>
    %cst_14 = arith.constant dense<0.000000e+00> : vector<2x128xf32>
    %16 = tpu.matmul %14, %15, %cst_14 {dimension_numbers = #tpu.dot_dimension_numbers<[1], [0], [0], [1], [0, 0, 1, 1], [], []>} : vector<2x128xf32>, vector<128x128xf32>, vector<2x128xf32> -> vector<2x128xf32>
    %c0_15 = arith.constant 0 : index
    %c0_16 = arith.constant 0 : index
    %17 = vector.load %arg7[%c0_15, %c0_16] : memref<1x128xf32, #tpu.memory_space<vmem>>, vector<1x128xf32>
    %18 = vector.broadcast %17 : vector<1x128xf32> to vector<2x128xf32>
    %19 = arith.addf %16, %18 : vector<2x128xf32>
    %c0_17 = arith.constant 0 : index
    %c0_18 = arith.constant 0 : index
    %20 = vector.load %arg8[%c0_17, %c0_18] : memref<2x128xf32, #tpu.memory_space<vmem>>, vector<2x128xf32>
    tpu.vector_store %arg8[%c0_17, %c0_18], %19 {strides = array<i32>} : memref<2x128xf32, #tpu.memory_space<vmem>>, vector<2x128xf32>,
    return
  }
  func.func @transform_0(%arg0: i32) -> (i32, i32) {
    %c0_i32 = arith.constant 0 : i32
    %c0_i32_0 = arith.constant 0 : i32
    return %arg0, %c0_i32 : i32, i32
  }
  func.func @transform_1(%arg0: i32) -> (i32, i32) {
    %c0_i32 = arith.constant 0 : i32
    %c0_i32_0 = arith.constant 0 : i32
    %c0_i32_1 = arith.constant 0 : i32
    return %c0_i32, %c0_i32_0 : i32, i32
  }
  func.func @transform_2(%arg0: i32) -> (i32, i32) {
    %c0_i32 = arith.constant 0 : i32
    %c0_i32_0 = arith.constant 0 : i32
    %c0_i32_1 = arith.constant 0 : i32
    return %c0_i32, %c0_i32_0 : i32, i32
  }
  func.func @transform_3(%arg0: i32) -> (i32, i32) {
    %c0_i32 = arith.constant 0 : i32
    %c0_i32_0 = arith.constant 0 : i32
    %c0_i32_1 = arith.constant 0 : i32
    return %c0_i32, %c0_i32_0 : i32, i32
  }
  func.func @transform_4(%arg0: i32) -> (i32, i32) {
    %c0_i32 = arith.constant 0 : i32
    %c0_i32_0 = arith.constant 0 : i32
    %c0_i32_1 = arith.constant 0 : i32
    return %c0_i32, %c0_i32_0 : i32, i32
  }
  func.func @transform_5(%arg0: i32) -> (i32, i32) {
    %c0_i32 = arith.constant 0 : i32
    %c0_i32_0 = arith.constant 0 : i32
    %c0_i32_1 = arith.constant 0 : i32
    return %c0_i32, %c0_i32_0 : i32, i32
  }
  func.func @transform_6(%arg0: i32) -> (i32, i32) {
    %c0_i32 = arith.constant 0 : i32
    %c0_i32_0 = arith.constant 0 : i32
    %c0_i32_1 = arith.constant 0 : i32
    return %c0_i32, %c0_i32_0 : i32, i32
  }
  func.func @transform_7(%arg0: i32) -> (i32, i32) {
    %c0_i32 = arith.constant 0 : i32
    %c0_i32_0 = arith.constant 0 : i32
    return %arg0, %c0_i32 : i32, i32
  }
}

</mosaic_0001>

<bundles_post_ra>
// kernel: tpu_custom_call.1
= control target key start
LH: loop header
LB: loop body
LE: loop exit
PB: predicated region body
PF: predicated region fallthrough
CT: control target
= control target key end

     0   :  { %12 = vsyncpa [#allocation3], 0  ;;  %s1237_s0 = inlined_call_operand.hbm [shape: f32[2,1024], index: 0, kind: input, shape index: {}]   ;;  %s1238_s1 = inlined_call_operand.hbm [shape: f32[1024,128], index: 1, kind: input, shape index: {}]   ;;  %s1239_s2 = inlined_call_operand.vmem [shape: f32[1,128], index: 2, kind: input, shape index: {}]   ;;  %s1240_s3 = inlined_call_operand.hbm [shape: f32[128,128], index: 3, kind: input, shape index: {}]   ;;  %s1241_s4 = inlined_call_operand.vmem [shape: f32[1,128], index: 4, kind: input, shape index: {}]   ;;  %s1242_s5 = inlined_call_operand.hbm [shape: f32[128,128], index: 5, kind: input, shape index: {}]   ;;  %s1243_s6 = inlined_call_operand.vmem [shape: f32[1,128], index: 6, kind: input, shape index: {}]   ;;  %s1244_s7 = inlined_call_operand.hbm [shape: f32[2,128], index: 7, kind: output, shape index: {}]  }
   0x1   :  { %13 = vsyncpa [#allocation6], 0 }
   0x2   :  { %14 = vsyncpa [#allocation9], 0 }
   0x3   :  { %15 = vsyncpa [#allocation4], 0  ;;  %s1114_s24 = smov [#allocation5]  }
   0x4   :  { %s31_s25 = sshll.u32 %s1114_s24, 4  ;;  %s32_s25 = int_to_ptr.vmem [resolvable:$true] %s31_s25 }
   0x5   :  { %s1014_s26 = scalar_lea.vmem %s32_s25, 16384  ;;  %p1019_p1 = scmp.lt.s32.totalorder %s32_s25, %s32_s25 }
   0x6   :  { %p1015_p0 = scmp.ne.s32.totalorder %s32_s25, %s1014_s26  ;;  %p1020_p2 = scmp.lt.s32.totalorder %s1014_s26, %s1014_s26 }
   0x8   :  { %p1021_p3 = por %p1020_p2, %p1019_p1 }
   0xa   :  { %p1022_p4 = pnand %p1021_p3, %p1015_p0 }
   0xc   :  { %1025 = shalt.err (!%p1022_p4)
}
   0xd   :  { %s1115_s27 = smov 128   ;;  %s1116_s28 = smov 8  }
   0xe   :  { %37 = dma.hbm_to_vmem [thread:$0]  %s1238_s1, 16384, %s32_s25, [#allocation6], %s1115_s27, %s1115_s27, %s1116_s28  }
   0xf   :  { %s1117_s8 = smov [#allocation2]   ;;  %s1118_s10 = smov [#allocation7]  }
  0x10   :  { %s22_s9 = sshll.u32 %s1117_s8, 4  ;;  %s45_s11 = sshll.u32 %s1118_s10, 4  ;;  %s23_s9 = int_to_ptr.vmem [resolvable:$true] %s22_s9  ;;  %s46_s11 = int_to_ptr.vmem [resolvable:$true] %s45_s11 }
  0x11   :  { %s1034_s12 = scalar_lea.vmem %s23_s9, 256  ;;  %p1039_p6 = scmp.lt.s32.totalorder %s23_s9, %s23_s9 }
  0x12   :  { %p1035_p5 = scmp.ne.s32.totalorder %s23_s9, %s1034_s12  ;;  %p1040_p7 = scmp.lt.s32.totalorder %s1034_s12, %s1034_s12 }
  0x14   :  { %p1041_p8 = por %p1040_p7, %p1039_p6 }
  0x16   :  { %p1042_p9 = pnand %p1041_p8, %p1035_p5 }
  0x18   :  { %1045 = shalt.err (!%p1042_p9)
}
  0x19   :  { %25 = dma.hbm_to_vmem [thread:$0]  %s1237_s0, 256, %s23_s9, [#allocation3]  }
  0x1a   :  { %s1054_s15 = scalar_lea.vmem %s46_s11, 2048  ;;  %p1059_p11 = scmp.lt.s32.totalorder %s46_s11, %s46_s11 }
  0x1b   :  { %p1055_p10 = scmp.ne.s32.totalorder %s46_s11, %s1054_s15  ;;  %p1060_p12 = scmp.lt.s32.totalorder %s1054_s15, %s1054_s15 }
  0x1d   :  { %p1061_p13 = por %p1060_p12, %p1059_p11 }
  0x1f   :  { %p1062_p0 = pnand %p1061_p13, %p1055_p10 }
  0x21   :  { %1065 = shalt.err (!%p1062_p0)
}
  0x22   :  { %51 = dma.hbm_to_vmem [thread:$0]  %s1240_s3, 2048, %s46_s11, [#allocation6], %s1115_s27, %s1115_s27, %s1116_s28  }
  0x23   :  { %s1119_s17 = smov [#allocation8]  }
  0x24   :  { %s59_s18 = sshll.u32 %s1119_s17, 4  ;;  %s60_s18 = int_to_ptr.vmem [resolvable:$true] %s59_s18 }
  0x25   :  { %s1074_s19 = scalar_lea.vmem %s60_s18, 2048  ;;  %p1079_p2 = scmp.lt.s32.totalorder %s60_s18, %s60_s18 }
  0x26   :  { %p1075_p1 = scmp.ne.s32.totalorder %s60_s18, %s1074_s19  ;;  %p1080_p3 = scmp.lt.s32.totalorder %s1074_s19, %s1074_s19 }
  0x28   :  { %p1081_p4 = por %p1080_p3, %p1079_p2 }
  0x2a   :  { %p1082_p5 = pnand %p1081_p4, %p1075_p1 }
  0x2c   :  { %1085 = shalt.err (!%p1082_p5)
}
  0x2d   :  { %65 = dma.hbm_to_vmem [thread:$0]  %s1242_s5, 2048, %s60_s18, [#allocation9], %s1115_s27, %s1115_s27, %s1116_s28  }
  0x2e   :  { %1106 = dma.done.wait [#allocation3], 256  }
  0x2f   :  { %1107 = vsyncadd [#allocation3], 4294967040 }
  0x30   :  { %1108 = dma.done.wait [#allocation6], 18432  }
  0x31   :  { %1109 = vsyncadd [#allocation6], 4294948864 }
  0x32   :  { %1110 = dma.done.wait [#allocation9], 2048  }
  0x33   :  { %1111 = vsyncadd [#allocation9], 4294965248  ;;  %v113_v0 = vld [vmem:[#allocation5 + $0xf8] sm:$0xff]  ;;  %v112_v4 = vld [vmem:[#allocation5 + $0xf0] sm:$0xff]  ;;  %v1120_v30 = vmov 1983009808   ;;  %v223_v32 = vlaneseq }
  0x34   :  { %v145_v1 = vld [vmem:[#allocation5 + $0x1f8] sm:$0xff]  ;;  %750 = vmatprep.subr.mxu0 %v113_v0  ;;  %v144_v5 = vld [vmem:[#allocation5 + $0x1f0] sm:$0xff]  ;;  %v111_v8 = vld [vmem:[#allocation5 + $0xe8] sm:$0xff]  ;;  %v221_v31 = vunpack.c.l.s4 %v1120_v30  ;;  %vm1122_vm0 = vmmov 0   ;;  %s1123_s24 = smov [#allocation10]  }
  0x35   :  { %v97_v2 = vld [vmem:[#allocation5 + $0x78] sm:$0xff]  ;;  %785 = vmatprep.subr.mxu1 %v145_v1  ;;  %v96_v6 = vld [vmem:[#allocation5 + $0x70] sm:$0xff]  ;;  %v143_v9 = vld [vmem:[#allocation5 + $0x1e8] sm:$0xff]  ;;  %v224_v42 = vshrl.u32 %v223_v32, 7  ;;  %s736_s25 = sshll.u32 %s1123_s24, 4  ;;  %s737_s25 = int_to_ptr.vmem [resolvable:$true] %s736_s25 }
  0x36   :  { %v129_v3 = vld [vmem:[#allocation5 + $0x178] sm:$0xff]  ;;  %751 = vmatpush3.msra.mxu0 %v97_v2  ;;  %v128_v7 = vld [vmem:[#allocation5 + $0x170] sm:$0xff]  ;;  %v95_v10 = vld [vmem:[#allocation5 + $0x68] sm:$0xff]  ;;  %v222_v41 = vunpack.c.0.s8 %v221_v31  ;;  %s1086_s26 = scalar_lea.vmem %s737_s25, 32  ;;  %p1091_p7 = scmp.lt.s32.totalorder %s737_s25, %s737_s25 }
  0x37   :  { %786 = vmatpush3.msra.mxu1 %v129_v3  ;;  %752 = vmatprep.subr.mxu0 %v112_v4  ;;  %v127_v11 = vld [vmem:[#allocation5 + $0x168] sm:$0xff]  ;;  %v110_v12 = vld [vmem:[#allocation5 + $0xe0] sm:$0xff]  ;;  %v109_v16 = vld [vmem:[#allocation5 + $0xd8] sm:$0xff]  ;;  %p1087_p6 = scmp.ne.s32.totalorder %s737_s25, %s1086_s26  ;;  %p1092_p8 = scmp.lt.s32.totalorder %s1086_s26, %s1086_s26 }
  0x38   :  { %787 = vmatprep.subr.mxu1 %v144_v5  ;;  %753 = vmatpush3.msra.mxu0 %v96_v6  ;;  %v142_v13 = vld [vmem:[#allocation5 + $0x1e0] sm:$0xff]  ;;  %v141_v17 = vld [vmem:[#allocation5 + $0x1d8] sm:$0xff]  ;;  %v108_v20 = vld [vmem:[#allocation5 + $0xd0] sm:$0xff]  ;;  %v1185_v51 = vsub.s32 %v222_v41, %v224_v42 }
  0x39   :  { %788 = vmatpush3.msra.mxu1 %v128_v7  ;;  %754 = vmatprep.subr.mxu0 %v111_v8  ;;  %v94_v14 = vld [vmem:[#allocation5 + $0x60] sm:$0xff]  ;;  %v93_v18 = vld [vmem:[#allocation5 + $0x58] sm:$0xff]  ;;  %v140_v21 = vld [vmem:[#allocation5 + $0x1d0] sm:$0xff]  ;;  %p1093_p9 = por %p1092_p8, %p1091_p7 }
  0x3a   :  { %789 = vmatprep.subr.mxu1 %v143_v9  ;;  %v126_v15 = vld [vmem:[#allocation5 + $0x160] sm:$0xff]  ;;  %755 = vmatpush3.msra.mxu0 %v95_v10  ;;  %v125_v19 = vld [vmem:[#allocation5 + $0x158] sm:$0xff]  ;;  %v92_v22 = vld [vmem:[#allocation5 + $0x50] sm:$0xff] }
  0x3b   :  { %790 = vmatpush3.msra.mxu1 %v127_v11  ;;  %756 = vmatprep.subr.mxu0 %v110_v12  ;;  %v124_v23 = vld [vmem:[#allocation5 + $0x150] sm:$0xff]  ;;  %v107_v24 = vld [vmem:[#allocation5 + $0xc8] sm:$0xff]  ;;  %v106_v28 = vld [vmem:[#allocation5 + $0xc0] sm:$0xff]  ;;  %p1094_p10 = pnand %p1093_p9, %p1087_p6 }
  0x3c   :  { %791 = vmatprep.subr.mxu1 %v142_v13  ;;  %757 = vmatpush3.msra.mxu0 %v94_v14  ;;  %v139_v25 = vld [vmem:[#allocation5 + $0x1c8] sm:$0xff]  ;;  %v138_v29 = vld [vmem:[#allocation5 + $0x1c0] sm:$0xff]  ;;  %v105_v35 = vld [vmem:[#allocation5 + $0xb8] sm:$0xff] }
  0x3d   :  { %792 = vmatpush3.msra.mxu1 %v126_v15  ;;  %758 = vmatprep.subr.mxu0 %v109_v16  ;;  %v91_v26 = vld [vmem:[#allocation5 + $0x48] sm:$0xff]  ;;  %v90_v33 = vld [vmem:[#allocation5 + $0x40] sm:$0xff]  ;;  %v137_v36 = vld [vmem:[#allocation5 + $0x1b8] sm:$0xff] }
  0x3e   :  { %793 = vmatprep.subr.mxu1 %v141_v17  ;;  %759 = vmatpush3.msra.mxu0 %v93_v18  ;;  %v123_v27 = vld [vmem:[#allocation5 + $0x148] sm:$0xff]  ;;  %v122_v34 = vld [vmem:[#allocation5 + $0x140] sm:$0xff]  ;;  %v89_v37 = vld [vmem:[#allocation5 + $0x38] sm:$0xff] }
  0x3f   :  { %794 = vmatpush3.msra.mxu1 %v125_v19  ;;  %760 = vmatprep.subr.mxu0 %v108_v20  ;;  %v121_v38 = vld [vmem:[#allocation5 + $0x138] sm:$0xff]  ;;  %v104_v39 = vld [vmem:[#allocation5 + $0xb0] sm:$0xff]  ;;  %v103_v45 = vld [vmem:[#allocation5 + $0xa8] sm:$0xff] }
  0x40   :  { %795 = vmatprep.subr.mxu1 %v140_v21  ;;  %761 = vmatpush3.msra.mxu0 %v92_v22  ;;  %v136_v40 = vld [vmem:[#allocation5 + $0x1b0] sm:$0xff]  ;;  %v135_v46 = vld [vmem:[#allocation5 + $0x1a8] sm:$0xff]  ;;  %v102_v49 = vld [vmem:[#allocation5 + $0xa0] sm:$0xff] }
  0x41   :  { %796 = vmatpush3.msra.mxu1 %v124_v23  ;;  %762 = vmatprep.subr.mxu0 %v107_v24  ;;  %v88_v43 = vld [vmem:[#allocation5 + $0x30] sm:$0xff]  ;;  %v87_v47 = vld [vmem:[#allocation5 + $0x28] sm:$0xff]  ;;  %v134_v50 = vld [vmem:[#allocation5 + $0x1a0] sm:$0xff] }
  0x42   :  { %797 = vmatprep.subr.mxu1 %v139_v25  ;;  %763 = vmatpush3.msra.mxu0 %v91_v26  ;;  %v120_v44 = vld [vmem:[#allocation5 + $0x130] sm:$0xff]  ;;  %v119_v48 = vld [vmem:[#allocation5 + $0x128] sm:$0xff]  ;;  %v86_v52 = vld [vmem:[#allocation5 + $0x20] sm:$0xff] }
  0x43   :  { %798 = vmatpush3.msra.mxu1 %v123_v27  ;;  %764 = vmatprep.subr.mxu0 %v106_v28  ;;  %v118_v53 = vld [vmem:[#allocation5 + $0x120] sm:$0xff]  ;;  %v80_v54 = vld [vmem:[#allocation2] sm:$0xff]  ;;  %v101_v55 = vld [vmem:[#allocation5 + $0x98] sm:$0xff] }
  0x44   :  { %799 = vmatprep.subr.mxu1 %v138_v29  ;;  %765 = vmatpush3.msra.mxu0 %v90_v33  ;;  %v133_v56 = vld [vmem:[#allocation5 + $0x198] sm:$0xff]  ;;  %v219_v57 = vcombine.high %v80_v54, %v80_v54  ;;  %v100_v60 = vld [vmem:[#allocation5 + $0x90] sm:$0xff]  ;;  %v226_v62 = vrot.slane %v80_v54, %v1185_v51  ;;  %v99_v1 = vld [vmem:[#allocation5 + $0x88] sm:$0xff] }
  0x45   :  { %800 = vmatpush3.msra.mxu1 %v122_v34  ;;  %766 = vmatprep.subr.mxu0 %v105_v35  ;;  %v85_v58 = vld [vmem:[#allocation5 + $0x18] sm:$0xff]  ;;  %v132_v61 = vld [vmem:[#allocation5 + $0x190] sm:$0xff]  ;;  %v131_v2 = vld [vmem:[#allocation5 + $0x188] sm:$0xff] }
  0x46   :  { %801 = vmatprep.subr.mxu1 %v137_v36  ;;  %767 = vmatpush3.msra.mxu0 %v89_v37  ;;  %v117_v59 = vld [vmem:[#allocation5 + $0x118] sm:$0xff]  ;;  %v84_v63 = vld [vmem:[#allocation5 + $0x10] sm:$0xff]  ;;  %v233_v3 = vrot.slane %v219_v57, %v1185_v51  ;;  %v83_v4 = vld [vmem:[#allocation5 + $0x8] sm:$0xff]  ;;  %v234_v8 = vcombine.high %v226_v62, %v226_v62 }
  0x47   :  { %802 = vmatpush3.msra.mxu1 %v121_v38  ;;  %768 = vmatprep.subr.mxu0 %v104_v39  ;;  %v116_v0 = vld [vmem:[#allocation5 + $0x110] sm:$0xff]  ;;  %v115_v5 = vld [vmem:[#allocation5 + $0x108] sm:$0xff]  ;;  %v98_v6 = vld [vmem:[#allocation5 + $0x80] sm:$0xff] }
  0x48   :  { %803 = vmatprep.subr.mxu1 %v136_v40  ;;  %769 = vmatpush3.msra.mxu0 %v88_v43  ;;  %v130_v7 = vld [vmem:[#allocation5 + $0x180] sm:$0xff]  ;;  %v235_v11 = vcombine.high %v233_v3, %v233_v3  ;;  %v177_v12 = vld [vmem:[#allocation5 + $0x2f8] sm:$0xff]  ;;  %v176_v16 = vld [vmem:[#allocation5 + $0x2f0] sm:$0xff] }
  0x49   :  { %804 = vmatpush3.msra.mxu1 %v120_v44  ;;  %770 = vmatprep.subr.mxu0 %v103_v45  ;;  %v82_v9 = vld [vmem:[#allocation5] sm:$0xff]  ;;  %v209_v13 = vld [vmem:[#allocation5 + $0x3f8] sm:$0xff]  ;;  %v208_v17 = vld [vmem:[#allocation5 + $0x3f0] sm:$0xff] }
  0x4a   :  { %805 = vmatprep.subr.mxu1 %v135_v46  ;;  %771 = vmatpush3.msra.mxu0 %v87_v47  ;;  %v114_v10 = vld [vmem:[#allocation5 + $0x100] sm:$0xff]  ;;  %v161_v14 = vld [vmem:[#allocation5 + $0x278] sm:$0xff]  ;;  %v160_v18 = vld [vmem:[#allocation5 + $0x270] sm:$0xff] }
  0x4b   :  { %806 = vmatpush3.msra.mxu1 %v119_v48  ;;  %772 = vmatprep.subr.mxu0 %v102_v49  ;;  %v193_v15 = vld [vmem:[#allocation5 + $0x378] sm:$0xff]  ;;  %v192_v19 = vld [vmem:[#allocation5 + $0x370] sm:$0xff]  ;;  %v175_v20 = vld [vmem:[#allocation5 + $0x2e8] sm:$0xff] }
  0x4c   :  { %807 = vmatprep.subr.mxu1 %v134_v50  ;;  %773 = vmatpush3.msra.mxu0 %v86_v52  ;;  %v207_v21 = vld [vmem:[#allocation5 + $0x3e8] sm:$0xff]  ;;  %v174_v24 = vld [vmem:[#allocation5 + $0x2e0] sm:$0xff]  ;;  %v173_v28 = vld [vmem:[#allocation5 + $0x2d8] sm:$0xff] }
  0x4d   :  { %808 = vmatpush3.msra.mxu1 %v118_v53  ;;  %774 = vmatprep.subr.mxu0 %v101_v55  ;;  %v159_v22 = vld [vmem:[#allocation5 + $0x268] sm:$0xff]  ;;  %v206_v25 = vld [vmem:[#allocation5 + $0x3e0] sm:$0xff]  ;;  %v205_v29 = vld [vmem:[#allocation5 + $0x3d8] sm:$0xff] }
  0x4e   :  { %809 = vmatprep.subr.mxu1 %v133_v56  ;;  %775 = vmatpush3.msra.mxu0 %v85_v58  ;;  %v191_v23 = vld [vmem:[#allocation5 + $0x368] sm:$0xff]  ;;  %v158_v26 = vld [vmem:[#allocation5 + $0x260] sm:$0xff]  ;;  %v157_v30 = vld [vmem:[#allocation5 + $0x258] sm:$0xff] }
  0x4f   :  { %810 = vmatpush3.msra.mxu1 %v117_v59  ;;  %776 = vmatprep.subr.mxu0 %v100_v60  ;;  %v190_v27 = vld [vmem:[#allocation5 + $0x360] sm:$0xff]  ;;  %v189_v31 = vld [vmem:[#allocation5 + $0x358] sm:$0xff]  ;;  %v172_v32 = vld [vmem:[#allocation5 + $0x2d0] sm:$0xff] }
  0x50   :  { %811 = vmatprep.subr.mxu1 %v132_v61  ;;  %777 = vmatpush3.msra.mxu0 %v84_v63  ;;  %v204_v33 = vld [vmem:[#allocation5 + $0x3d0] sm:$0xff]  ;;  %v171_v36 = vld [vmem:[#allocation5 + $0x2c8] sm:$0xff]  ;;  %v170_v40 = vld [vmem:[#allocation5 + $0x2c0] sm:$0xff] }
  0x51   :  { %812 = vmatpush3.msra.mxu1 %v116_v0  ;;  %778 = vmatprep.subr.mxu0 %v99_v1  ;;  %v156_v34 = vld [vmem:[#allocation5 + $0x250] sm:$0xff]  ;;  %v203_v37 = vld [vmem:[#allocation5 + $0x3c8] sm:$0xff]  ;;  %v202_v41 = vld [vmem:[#allocation5 + $0x3c0] sm:$0xff] }
  0x52   :  { %813 = vmatprep.subr.mxu1 %v131_v2  ;;  %779 = vmatpush3.msra.mxu0 %v83_v4  ;;  %v188_v35 = vld [vmem:[#allocation5 + $0x350] sm:$0xff]  ;;  %v155_v38 = vld [vmem:[#allocation5 + $0x248] sm:$0xff]  ;;  %v154_v42 = vld [vmem:[#allocation5 + $0x240] sm:$0xff] }
  0x53   :  { %814 = vmatpush3.msra.mxu1 %v115_v5  ;;  %780 = vmatprep.subr.mxu0 %v98_v6  ;;  %v187_v39 = vld [vmem:[#allocation5 + $0x348] sm:$0xff]  ;;  %v186_v43 = vld [vmem:[#allocation5 + $0x340] sm:$0xff]  ;;  %v169_v44 = vld [vmem:[#allocation5 + $0x2b8] sm:$0xff] }
  0x54   :  { %815 = vmatprep.subr.mxu1 %v130_v7  ;;  %781 = vmatpush3.msra.mxu0 %v82_v9  ;;  %v201_v45 = vld [vmem:[#allocation5 + $0x3b8] sm:$0xff]  ;;  %v168_v48 = vld [vmem:[#allocation5 + $0x2b0] sm:$0xff]  ;;  %v167_v53 = vld [vmem:[#allocation5 + $0x2a8] sm:$0xff] }
  0x55   :  { %325 = vmatprep.mubr.f32.mxu0 %v234_v8  ;;  %816 = vmatpush3.msra.mxu1 %v114_v10  ;;  %v153_v46 = vld [vmem:[#allocation5 + $0x238] sm:$0xff]  ;;  %v200_v49 = vld [vmem:[#allocation5 + $0x3b0] sm:$0xff]  ;;  %v199_v54 = vld [vmem:[#allocation5 + $0x3a8] sm:$0xff] }
  0x56   :  { %326 = vmatmul.mubr.f32.vlgmr.msra.gmra.mxu0 %v226_v62  ;;  %395 = vmatprep.mubr.f32.mxu1 %v235_v11  ;;  %v185_v47 = vld [vmem:[#allocation5 + $0x338] sm:$0xff]  ;;  %v152_v50 = vld [vmem:[#allocation5 + $0x230] sm:$0xff]  ;;  %v151_v56 = vld [vmem:[#allocation5 + $0x228] sm:$0xff] }
  0x57   :  { %820 = vmatprep.subr.mxu0 %v177_v12  ;;  %855 = vmatprep.subr.mxu1 %v209_v13  ;;  %v184_v52 = vld [vmem:[#allocation5 + $0x330] sm:$0xff]  ;;  %v81_v55 = vld [vmem:[#allocation2 + $0x8] sm:$0xff]  ;;  %v183_v57 = vld [vmem:[#allocation5 + $0x328] sm:$0xff] }
  0x58   :  { %396 = vmatmul.mubr.f32.vlgmr.msra.gmra.mxu1 %v233_v3  ;;  %821 = vmatpush3.msra.mxu0 %v161_v14  ;;  %v166_v58 = vld [vmem:[#allocation5 + $0x2a0] sm:$0xff]  ;;  %v236_v62 = vcombine.high %v81_v55, %v81_v55  ;;  %v165_v63 = vld [vmem:[#allocation5 + $0x298] sm:$0xff]  ;;  %v164_v3 = vld [vmem:[#allocation5 + $0x290] sm:$0xff]  ;;  %v243_v5 = vrot.slane %v81_v55, %v1185_v51 }
  0x59   :  { %856 = vmatpush3.msra.mxu1 %v193_v15  ;;  %822 = vmatprep.subr.mxu0 %v176_v16  ;;  %v198_v59 = vld [vmem:[#allocation5 + $0x3a0] sm:$0xff]  ;;  %v197_v0 = vld [vmem:[#allocation5 + $0x398] sm:$0xff]  ;;  %v196_v4 = vld [vmem:[#allocation5 + $0x390] sm:$0xff] }
  0x5a   :  { %857 = vmatprep.subr.mxu1 %v208_v17  ;;  %823 = vmatpush3.msra.mxu0 %v160_v18  ;;  %v150_v60 = vld [vmem:[#allocation5 + $0x220] sm:$0xff]  ;;  %v149_v1 = vld [vmem:[#allocation5 + $0x218] sm:$0xff]  ;;  %v148_v6 = vld [vmem:[#allocation5 + $0x210] sm:$0xff]  ;;  %v250_v8 = vrot.slane %v236_v62, %v1185_v51  ;;  %v251_v15 = vcombine.high %v243_v5, %v243_v5 }
  0x5b   :  { %858 = vmatpush3.msra.mxu1 %v192_v19  ;;  %824 = vmatprep.subr.mxu0 %v175_v20  ;;  %v182_v61 = vld [vmem:[#allocation5 + $0x320] sm:$0xff]  ;;  %v181_v2 = vld [vmem:[#allocation5 + $0x318] sm:$0xff]  ;;  %v180_v7 = vld [vmem:[#allocation5 + $0x310] sm:$0xff]  ;;  %v1121_v19 = vmov 0.0  }
  0x5c   :  { %859 = vmatprep.subr.mxu1 %v207_v21  ;;  %825 = vmatpush3.msra.mxu0 %v159_v22  ;;  %v163_v9 = vld [vmem:[#allocation5 + $0x288] sm:$0xff]  ;;  %v162_v13 = vld [vmem:[#allocation5 + $0x280] sm:$0xff]  ;;  %v252_v17 = vcombine.high %v250_v8, %v250_v8  ;;  %v557_v18 = vld [vmem:[#allocation7 + $0x78] sm:$0xff] }
  0x5d   :  { %860 = vmatpush3.msra.mxu1 %v191_v23  ;;  %826 = vmatprep.subr.mxu0 %v174_v24  ;;  %v195_v10 = vld [vmem:[#allocation5 + $0x388] sm:$0xff]  ;;  %v194_v14 = vld [vmem:[#allocation5 + $0x380] sm:$0xff]  ;;  %v556_v20 = vld [vmem:[#allocation7 + $0x70] sm:$0xff] }
  0x5e   :  { %861 = vmatprep.subr.mxu1 %v206_v25  ;;  %827 = vmatpush3.msra.mxu0 %v158_v26  ;;  %v147_v11 = vld [vmem:[#allocation5 + $0x208] sm:$0xff]  ;;  %v146_v16 = vld [vmem:[#allocation5 + $0x200] sm:$0xff]  ;;  %v553_v23 = vld [vmem:[#allocation7 + $0x58] sm:$0xff] }
  0x5f   :  { %862 = vmatpush3.msra.mxu1 %v190_v27  ;;  %828 = vmatprep.subr.mxu0 %v173_v28  ;;  %v179_v12 = vld [vmem:[#allocation5 + $0x308] sm:$0xff]  ;;  %v178_v51 = vld [vmem:[#allocation5 + $0x300] sm:$0xff]  ;;  %v552_v24 = vld [vmem:[#allocation7 + $0x50] sm:$0xff] }
  0x60   :  { %863 = vmatprep.subr.mxu1 %v205_v29  ;;  %829 = vmatpush3.msra.mxu0 %v157_v30  ;;  %v555_v21 = vld [vmem:[#allocation7 + $0x68] sm:$0xff]  ;;  %v554_v22 = vld [vmem:[#allocation7 + $0x60] sm:$0xff]  ;;  %v549_v27 = vld [vmem:[#allocation7 + $0x38] sm:$0xff] }
  0x61   :  { %864 = vmatpush3.msra.mxu1 %v189_v31  ;;  %830 = vmatprep.subr.mxu0 %v172_v32  ;;  %v551_v25 = vld [vmem:[#allocation7 + $0x48] sm:$0xff]  ;;  %v550_v26 = vld [vmem:[#allocation7 + $0x40] sm:$0xff]  ;;  %v548_v28 = vld [vmem:[#allocation7 + $0x30] sm:$0xff] }
  0x62   :  { %865 = vmatprep.subr.mxu1 %v204_v33  ;;  %831 = vmatpush3.msra.mxu0 %v156_v34  ;;  %v547_v29 = vld [vmem:[#allocation7 + $0x28] sm:$0xff]  ;;  %v546_v30 = vld [vmem:[#allocation7 + $0x20] sm:$0xff]  ;;  %v545_v31 = vld [vmem:[#allocation7 + $0x18] sm:$0xff] }
  0x63   :  { %866 = vmatpush3.msra.mxu1 %v188_v35  ;;  %832 = vmatprep.subr.mxu0 %v171_v36  ;;  %v544_v32 = vld [vmem:[#allocation7 + $0x10] sm:$0xff]  ;;  %v543_v33 = vld [vmem:[#allocation7 + $0x8] sm:$0xff]  ;;  %v542_v34 = vld [vmem:[#allocation7] sm:$0xff] }
  0x64   :  { %867 = vmatprep.subr.mxu1 %v203_v37  ;;  %833 = vmatpush3.msra.mxu0 %v155_v38  ;;  %v651_v35 = vld [vmem:[#allocation8 + $0x78] sm:$0xff]  ;;  %v650_v36 = vld [vmem:[#allocation8 + $0x70] sm:$0xff]  ;;  %v649_v37 = vld [vmem:[#allocation8 + $0x68] sm:$0xff] }
  0x65   :  { %868 = vmatpush3.msra.mxu1 %v187_v39  ;;  %834 = vmatprep.subr.mxu0 %v170_v40  ;;  %v648_v38 = vld [vmem:[#allocation8 + $0x60] sm:$0xff]  ;;  %v647_v39 = vld [vmem:[#allocation8 + $0x58] sm:$0xff]  ;;  %v646_v40 = vld [vmem:[#allocation8 + $0x50] sm:$0xff] }
  0x66   :  { %869 = vmatprep.subr.mxu1 %v202_v41  ;;  %835 = vmatpush3.msra.mxu0 %v154_v42  ;;  %v645_v41 = vld [vmem:[#allocation8 + $0x48] sm:$0xff]  ;;  %v644_v42 = vld [vmem:[#allocation8 + $0x40] sm:$0xff] }
  0x67   :  { %870 = vmatpush3.msra.mxu1 %v186_v43  ;;  %836 = vmatprep.subr.mxu0 %v169_v44  ;;  %v643_v43 = vld [vmem:[#allocation8 + $0x38] sm:$0xff]  ;;  %v642_v44 = vld [vmem:[#allocation8 + $0x30] sm:$0xff] }
  0x68   :  { %871 = vmatprep.subr.mxu1 %v201_v45  ;;  %837 = vmatpush3.msra.mxu0 %v153_v46  ;;  %v641_v45 = vld [vmem:[#allocation8 + $0x28] sm:$0xff]  ;;  %v640_v46 = vld [vmem:[#allocation8 + $0x20] sm:$0xff] }
  0x69   :  { %872 = vmatpush3.msra.mxu1 %v185_v47  ;;  %838 = vmatprep.subr.mxu0 %v168_v48  ;;  %v639_v47 = vld [vmem:[#allocation8 + $0x18] sm:$0xff] }
  0x6a   :  { %873 = vmatprep.subr.mxu1 %v200_v49  ;;  %839 = vmatpush3.msra.mxu0 %v152_v50 }
  0x6b   :  { %874 = vmatpush3.msra.mxu1 %v184_v52  ;;  %840 = vmatprep.subr.mxu0 %v167_v53  ;;  %v747_v53 = vld [vmem:[%s1239_s2] ss:$0 sm:$0xff] }
  0x6c   :  { %875 = vmatprep.subr.mxu1 %v199_v54  ;;  %841 = vmatpush3.msra.mxu0 %v151_v56 }
  0x6d   :  { %876 = vmatpush3.msra.mxu1 %v183_v57  ;;  %842 = vmatprep.subr.mxu0 %v166_v58 }
  0x6e   :  { %877 = vmatprep.subr.mxu1 %v198_v59  ;;  %843 = vmatpush3.msra.mxu0 %v150_v60 }
  0x6f   :  { %878 = vmatpush3.msra.mxu1 %v182_v61  ;;  %844 = vmatprep.subr.mxu0 %v165_v63 }
  0x70   :  { %879 = vmatprep.subr.mxu1 %v197_v0  ;;  %845 = vmatpush3.msra.mxu0 %v149_v1 }
  0x71   :  { %880 = vmatpush3.msra.mxu1 %v181_v2  ;;  %846 = vmatprep.subr.mxu0 %v164_v3  ;;  %v638_v3 = vld [vmem:[#allocation8 + $0x10] sm:$0xff] }
  0x72   :  { %881 = vmatprep.subr.mxu1 %v196_v4  ;;  %847 = vmatpush3.msra.mxu0 %v148_v6  ;;  %v637_v4 = vld [vmem:[#allocation8 + $0x8] sm:$0xff]  ;;  %v748_v6 = vld [vmem:[%s1241_s4] ss:$0 sm:$0xff] }
  0x73   :  { %882 = vmatpush3.msra.mxu1 %v180_v7  ;;  %848 = vmatprep.subr.mxu0 %v163_v9 }
  0x74   :  { %883 = vmatprep.subr.mxu1 %v195_v10  ;;  %849 = vmatpush3.msra.mxu0 %v147_v11  ;;  %v749_v11 = vld [vmem:[%s1243_s6] ss:$0 sm:$0xff] }
  0x75   :  { %884 = vmatpush3.msra.mxu1 %v179_v12  ;;  %850 = vmatprep.subr.mxu0 %v162_v13 }
  0x76   :  { %885 = vmatprep.subr.mxu1 %v194_v14  ;;  %851 = vmatpush3.msra.mxu0 %v146_v16 }
  0x77   :  { %465 = vmatprep.mubr.f32.mxu0 %v251_v15  ;;  %886 = vmatpush3.msra.mxu1 %v178_v51 }
  0x78   :  { %535 = vmatprep.mubr.f32.mxu1 %v252_v17  ;;  %466 = vmatmul.mubr.f32.vlgmr.msra.gmra.mxu0 %v243_v5  ;;  %v636_v5 = vld [vmem:[#allocation8] sm:$0xff] }
  0x79   :  { %536 = vmatmul.mubr.f32.vlgmr.msra.gmra.mxu1 %v250_v8  ;;  %924 = vmatprep.subr.mxu0 %v1121_v19 }
  0x7a   :  { %959 = vmatprep.subr.mxu1 %v1121_v19  ;;  %925 = vmatpush3.msra.mxu0 %v557_v18 }
  0x7b   :  { %926 = vmatprep.subr.mxu0 %v1121_v19  ;;  %956 = vmatprep.mubr.msk.f32.mxu0 %vm1122_vm0, %v1121_v19 }
  0x7c   :  { %927 = vmatpush3.msra.mxu0 %v556_v20  ;;  %991 = vmatprep.mubr.msk.f32.mxu1 %vm1122_vm0, %v1121_v19 }
  0x7d   :  { %928 = vmatprep.subr.mxu0 %v1121_v19  ;;  %960 = vmatpush3.msra.mxu1 %v651_v35 }
  0x7e   :  { %929 = vmatpush3.msra.mxu0 %v555_v21  ;;  %961 = vmatprep.subr.mxu1 %v1121_v19 }
  0x7f   :  { %930 = vmatprep.subr.mxu0 %v1121_v19  ;;  %962 = vmatpush3.msra.mxu1 %v650_v36 }
  0x80   :  { %931 = vmatpush3.msra.mxu0 %v554_v22  ;;  %963 = vmatprep.subr.mxu1 %v1121_v19 }
  0x81   :  { %932 = vmatprep.subr.mxu0 %v1121_v19  ;;  %964 = vmatpush3.msra.mxu1 %v649_v37 }
  0x82   :  { %933 = vmatpush3.msra.mxu0 %v553_v23  ;;  %965 = vmatprep.subr.mxu1 %v1121_v19 }
  0x83   :  { %934 = vmatprep.subr.mxu0 %v1121_v19  ;;  %966 = vmatpush3.msra.mxu1 %v648_v38 }
  0x84   :  { %935 = vmatpush3.msra.mxu0 %v552_v24  ;;  %967 = vmatprep.subr.mxu1 %v1121_v19 }
  0x85   :  { %936 = vmatprep.subr.mxu0 %v1121_v19  ;;  %968 = vmatpush3.msra.mxu1 %v647_v39 }
  0x86   :  { %937 = vmatpush3.msra.mxu0 %v551_v25  ;;  %969 = vmatprep.subr.mxu1 %v1121_v19 }
  0x87   :  { %938 = vmatprep.subr.mxu0 %v1121_v19  ;;  %970 = vmatpush3.msra.mxu1 %v646_v40 }
  0x88   :  { %939 = vmatpush3.msra.mxu0 %v550_v26  ;;  %971 = vmatprep.subr.mxu1 %v1121_v19 }
  0x89   :  { %940 = vmatprep.subr.mxu0 %v1121_v19  ;;  %972 = vmatpush3.msra.mxu1 %v645_v41 }
  0x8a   :  { %941 = vmatpush3.msra.mxu0 %v549_v27  ;;  %973 = vmatprep.subr.mxu1 %v1121_v19 }
  0x8b   :  { %942 = vmatprep.subr.mxu0 %v1121_v19  ;;  %974 = vmatpush3.msra.mxu1 %v644_v42 }
  0x8c   :  { %943 = vmatpush3.msra.mxu0 %v548_v28  ;;  %975 = vmatprep.subr.mxu1 %v1121_v19 }
  0x8d   :  { %944 = vmatprep.subr.mxu0 %v1121_v19  ;;  %976 = vmatpush3.msra.mxu1 %v643_v43 }
  0x8e   :  { %945 = vmatpush3.msra.mxu0 %v547_v29  ;;  %977 = vmatprep.subr.mxu1 %v1121_v19 }
  0x8f   :  { %946 = vmatprep.subr.mxu0 %v1121_v19  ;;  %978 = vmatpush3.msra.mxu1 %v642_v44 }
  0x90   :  { %947 = vmatpush3.msra.mxu0 %v546_v30  ;;  %979 = vmatprep.subr.mxu1 %v1121_v19 }
  0x91   :  { %948 = vmatprep.subr.mxu0 %v1121_v19  ;;  %980 = vmatpush3.msra.mxu1 %v641_v45 }
  0x92   :  { %949 = vmatpush3.msra.mxu0 %v545_v31  ;;  %981 = vmatprep.subr.mxu1 %v1121_v19 }
  0x93   :  { %950 = vmatprep.subr.mxu0 %v1121_v19  ;;  %982 = vmatpush3.msra.mxu1 %v640_v46 }
  0x94   :  { %951 = vmatpush3.msra.mxu0 %v544_v32  ;;  %983 = vmatprep.subr.mxu1 %v1121_v19 }
  0x95   :  { %952 = vmatprep.subr.mxu0 %v1121_v19  ;;  %984 = vmatpush3.msra.mxu1 %v639_v47 }
  0x96   :  { %953 = vmatpush3.msra.mxu0 %v543_v33  ;;  %985 = vmatprep.subr.mxu1 %v1121_v19 }
  0x97   :  { %954 = vmatprep.subr.mxu0 %v1121_v19  ;;  %986 = vmatpush3.msra.mxu1 %v638_v3 }
  0x98   :  { %955 = vmatpush3.msra.mxu0 %v542_v34  ;;  %987 = vmatprep.subr.mxu1 %v1121_v19 }
  0x99   :  { %988 = vmatpush3.msra.mxu1 %v637_v4 }
  0x9a   :  { %989 = vmatprep.subr.mxu1 %v1121_v19 }
  0x9b   :  { %990 = vmatpush3.msra.mxu1 %v636_v5 }
 0x116   :  { %v782_v48 = vpop.f32.mrf.mxu0 }
 0x118   :  { %v817_v49 = vpop.f32.mrf.mxu1  ;;  %v783_v50 = vpop.f32.mrf.mxu0 }
 0x119   :  { %v784_v52 = vadd.f32 %v783_v50, %v782_v48 }
 0x11a   :  { %v818_v54 = vpop.f32.mrf.mxu1 }
 0x11b   :  { %v328_v55 = vadd.f32 %v784_v52, %v747_v53  ;;  %v819_v56 = vadd.f32 %v818_v54, %v817_v49 }
 0x11d   :  { %v398_v61 = vadd.f32 %v819_v56, %v328_v55 }
 0x138   :  { %v852_v57 = vpop.f32.mrf.mxu0 }
 0x139   :  { %v887_v58 = vpop.f32.mrf.mxu1 }
 0x13a   :  { %v853_v59 = vpop.f32.mrf.mxu0 }
 0x13b   :  { %v888_v60 = vpop.f32.mrf.mxu1  ;;  %v854_v62 = vadd.f32 %v853_v59, %v852_v57 }
 0x13c   :  { %v889_v0 = vadd.f32 %v888_v60, %v887_v58 }
 0x13d   :  { %v468_v63 = vadd.f32 %v854_v62, %v398_v61 }
 0x13f   :  { %v538_v1 = vadd.f32 %v889_v0, %v468_v63 }
 0x141   :  { %v541_v2 = vmax.f32 %v538_v1, 0.0 }
 0x143   :  { %957 = vmatmul.mubr.f32.vlgmr.msra.gmra.mxu0 %v541_v2 }
 0x203   :  { %v631_v7 = vpop.f32.mrf.mxu0 }
 0x204   :  { %v632_v8 = vadd.f32 %v748_v6, %v631_v7 }
 0x205   :  { %v958_v9 = vpop.f32.mrf.mxu0 }
 0x206   :  { %v635_v10 = vmax.f32 %v632_v8, 0.0 }
 0x208   :  { %992 = vmatmul.mubr.f32.vlgmr.msra.gmra.mxu1 %v635_v10 }
 0x2c8   :  { %v725_v12 = vpop.f32.mrf.mxu1 }
 0x2c9   :  { %v726_v13 = vadd.f32 %v749_v11, %v725_v12 }
 0x2ca   :  { %v993_v14 = vpop.f32.mrf.mxu1 }
 0x2cb   :  { %729 = vst [vmem:[#allocation10] sm:$0x3] %v726_v13 }
 0x2cc   :  { %1097 = shalt.err (!%p1094_p10)
}
 0x2cd   :  { %739 = dma.vmem_to_hbm [thread:$0]  %s737_s25, 32, %s1244_s7, [#allocation4]  }
 0x2ce   :  { %1112 = dma.done.wait [#allocation4], 32  }
 0x2cf   :  { %1113 = vsyncadd [#allocation4], 4294967264 }
 0x2d0   :  { %743 = vsyncpa [#allocation3], 1 }
 0x2d1   :  { %744 = vsyncpa [#allocation6], 1 }
 0x2d2   :  { %745 = vsyncpa [#allocation9], 1 }
 0x2d3   :  { %746 = vsyncpa [#allocation4], 1 }

</bundles_post_ra>
